<compile_context>
chip_gen: v5e
topology: v5e:2x2
jax: 0.10.0
libtpu: 0.0.40
codegen_flags: <defaults>
</compile_context>

<pallas_src>
import jax
import jax.numpy as jnp
import numpy as np
from jax.experimental import pallas as pl
from jax.experimental.pallas import tpu as pltpu


def _round_up(a, b):
    return (a + b - 1) // b * b


def _vmem_capacity_bytes():
    """Per-generation VMEM capacity (64 MiB on v7x, 128 MiB on v5e/v6e)."""
    try:
        info = pltpu.get_tpu_info()
        cap = getattr(info, "vmem_capacity_bytes", None)
        if cap:
            return int(cap)
    except Exception:
        pass
    return 128 * 1024 * 1024  # conservative fallback only


# Resident (constant index_map) operands: single-buffer them to halve their
# VMEM footprint — this is what keeps large c_half viable inside v7x's 64 MiB.
_RESIDENT = {"pipeline_mode": pl.Buffered(1)} if hasattr(pl, "Buffered") else {}


# --------------------------------------------------------------------------
# Pallas kernel: additive coupling forward  y = fn(x)
# --------------------------------------------------------------------------
def _coupling_fwd_kernel(x_ref, wf_ref, bf_ref, wg_ref, bg_ref, y_ref):
    c_half = x_ref.shape[-1] // 2

    # Static, lane-aligned half slices of the single contiguous x tile.
    x1 = x_ref[:, :c_half].astype(jnp.float32)            # (TN, c_half)
    x2 = x_ref[:, c_half:].astype(jnp.float32)            # (TN, c_half)

    # F(x2) = relu(x2 @ Wf + bf): bf16 MXU matmul, f32 accumulation;
    # bias / relu / residual on the VPU in f32.
    f = jnp.dot(x2.astype(jnp.bfloat16), wf_ref[...],
                preferred_element_type=jnp.float32)
    y1 = x1 + jnp.maximum(f + bf_ref[...], 0.0)

    # G(y1) = relu(y1 @ Wg + bg)
    g = jnp.dot(y1.astype(jnp.bfloat16), wg_ref[...],
                preferred_element_type=jnp.float32)
    y2 = x2 + jnp.maximum(g + bg_ref[...], 0.0)

    # Two direct, lane-aligned half writes (c_half % 128 == 0) — no concat.
    y_ref[:, :c_half] = y1.astype(y_ref.dtype)
    y_ref[:, c_half:] = y2.astype(y_ref.dtype)


def coupling_forward_pallas(x, wf, bf, wg, bg, *, tile_n=None):
    """y = fn(x) for the additive coupling block, via pallas_call."""
    n, c = x.shape
    assert c % 2 == 0
    c_half = c // 2
    # Lane-dense layout: the in-kernel half slices and the two half stores
    # require the half-width to be a multiple of the 128 lanes.
    assert c_half % 128 == 0, "c_half must be a multiple of 128 (pad channels)"

    itemsize_x = jnp.dtype(x.dtype).itemsize
    w_itemsize = jnp.dtype(wf.dtype).itemsize

    cap = _vmem_capacity_bytes()
    usable = int(cap * 0.85)                       # leave compiler headroom

    if tile_n is None:
        # Bigger default row tile where 128 MiB VMEM allows it (v5e/v6e).
        tile_n = 1024 if usable >= 96 * 1024 * 1024 else 512

    # --- VMEM footprint model (per grid step) -----------------------------
    # x tile (2 bufs) + y tile (2 bufs) + f32 intermediates (x1, x2, f, y1,
    # g, y2), plus single-buffered resident weights & biases.
    weight_bytes = 2 * c_half * c_half * w_itemsize + 2 * c_half * 4
    per_row_bytes = (2 * c * itemsize_x            # x tile, double buffered
                     + 2 * c * itemsize_x          # y tile, double buffered
                     + 8 * c_half * 4)             # f32 intermediates + slack
    budget = usable - weight_bytes - (4 << 20)     # 4 MiB compiler scratch
    vmem_row_cap = max(8, (max(budget, 0) // per_row_bytes) // 8 * 8)
    # TODO(synk): for c_half >= ~4096 the resident bf16 weights no longer fit
    # v7x VMEM; an inner K/N-blocked weight pipeline (pltpu.emit_pipeline)
    # would be required instead of whole-matrix residency.

    # Keep >= ~8 grid steps when N allows it (>= 4 per core under megacore
    # "parallel" sharding on v7x), but never shrink the tile below 64 rows
    # just to manufacture steps.
    step_cap = max(64, _round_up(-(-n // 8), 8))

    eff_tile = min(int(tile_n), vmem_row_cap, step_cap, _round_up(n, 8))
    eff_tile = max(8, _round_up(eff_tile, 8))

    # Ragged last block is handled by Pallas (stores are masked); no pad/slice
    # HBM round trips.
    grid = (pl.cdiv(n, eff_tile),)

    vmem_needed = eff_tile * per_row_bytes + weight_bytes
    vmem_limit = int(min(max(vmem_needed * 3 // 2, 32 * 1024 * 1024), usable))

    return pl.pallas_call(
        _coupling_fwd_kernel,
        out_shape=jax.ShapeDtypeStruct((n, c), x.dtype),
        grid=grid,
        in_specs=[
            # x passed once: one fully contiguous DMA per step.
            pl.BlockSpec((eff_tile, c), lambda i: (i, 0)),
            pl.BlockSpec((c_half, c_half), lambda i: (0, 0), **_RESIDENT),  # Wf
            pl.BlockSpec((1, c_half), lambda i: (0, 0), **_RESIDENT),       # bf
            pl.BlockSpec((c_half, c_half), lambda i: (0, 0), **_RESIDENT),  # Wg
            pl.BlockSpec((1, c_half), lambda i: (0, 0), **_RESIDENT),       # bg
        ],
        out_specs=pl.BlockSpec((eff_tile, c), lambda i: (i, 0)),
        compiler_params=pltpu.CompilerParams(
            dimension_semantics=("parallel",),
            vmem_limit_bytes=vmem_limit,
        ),
    )(x, wf, bf, wg, bg)


# --------------------------------------------------------------------------
# Minimal JAX-side equivalents of the PyTorch classes
# --------------------------------------------------------------------------
class AdditiveCouplingFn:
    """The invertible `fn` wrapped by InvertibleModuleWrapper."""

    def __init__(self, hidden, key, tile_n=None):
        c_half = hidden // 2
        k1, k2, k3, k4 = jax.random.split(key, 4)
        scale = 1.0 / np.sqrt(c_half)
        # Weights in bf16 (halves HBM traffic, full MXU bf16 rate); biases f32.
        self.wf = (jax.random.normal(k1, (c_half, c_half), jnp.float32)
                   * scale).astype(jnp.bfloat16)
        self.bf = jax.random.normal(k2, (1, c_half), jnp.float32) * 0.1
        self.wg = (jax.random.normal(k3, (c_half, c_half), jnp.float32)
                   * scale).astype(jnp.bfloat16)
        self.bg = jax.random.normal(k4, (1, c_half), jnp.float32) * 0.1
        self.tile_n = tile_n

    def forward(self, x):
        return coupling_forward_pallas(x, self.wf, self.bf, self.wg, self.bg,
                                       tile_n=self.tile_n)

    def inverse(self, y):
        # Plain-JAX inverse (not the hot path); same bf16-matmul / f32-acc
        # numerics as the kernel, so x == inverse(forward(x)) up to f32
        # rounding of the residual add/sub.
        c_half = y.shape[-1] // 2
        y1, y2 = y[:, :c_half], y[:, c_half:]
        g = jnp.maximum(
            jnp.dot(y1.astype(jnp.bfloat16), self.wg,
                    preferred_element_type=jnp.float32) + self.bg, 0.0)
        x2 = y2 - g
        f = jnp.maximum(
            jnp.dot(x2.astype(jnp.bfloat16), self.wf,
                    preferred_element_type=jnp.float32) + self.bf, 0.0)
        x1 = y1 - f
        return jnp.concatenate([x1, x2], axis=-1).astype(y.dtype)


class InvertibleModuleWrapper:
    """JAX port of the PyTorch InvertibleModuleWrapper.

    Forward semantics: y = fn(*xin); a 1-tuple result is unwrapped.
    """

    def __init__(self, fn, keep_input=False, keep_input_inverse=False,
                 num_bwd_passes=1, disable=False, preserve_rng_state=False):
        self.disable = disable
        self.keep_input = keep_input
        self.keep_input_inverse = keep_input_inverse
        self.num_bwd_passes = num_bwd_passes
        self.preserve_rng_state = preserve_rng_state
        self._fn = fn
        # TODO(synk): InvertibleCheckpointFunction's backward-time input
        # reconstruction / storage().resize_(0) freeing / RNG forking is
        # training-memory bookkeeping with no Pallas forward equivalent.

    def reset_parameters(self):
        if hasattr(self._fn, "reset_parameters"):
            self._fn.reset_parameters()

    def forward(self, *xin):
        y = self._fn.forward(*xin)
        if isinstance(y, tuple) and len(y) == 1:
            return y[0]
        return y

    def inverse(self, *yin):
        x = self._fn.inverse(*yin)
        if isinstance(x, tuple) and len(x) == 1:
            return x[0]
        return x

    __call__ = forward


# --------------------------------------------------------------------------
# Reference (pure jnp, same bf16-matmul numerics) for correctness check
# --------------------------------------------------------------------------
def _reference_forward(x, wf, bf, wg, bg):
    c_half = x.shape[-1] // 2
    x1 = x[:, :c_half].astype(jnp.float32)
    x2 = x[:, c_half:].astype(jnp.float32)
    f = jnp.dot(x2.astype(jnp.bfloat16), wf, preferred_element_type=jnp.float32)
    y1 = x1 + jnp.maximum(f + bf, 0.0)
    g = jnp.dot(y1.astype(jnp.bfloat16), wg, preferred_element_type=jnp.float32)
    y2 = x2 + jnp.maximum(g + bg, 0.0)
    return jnp.concatenate([y1, y2], axis=-1).astype(x.dtype)


if __name__ == "__main__":
    key = jax.random.PRNGKey(0)
    k_x, k_fn, k_x2 = jax.random.split(key, 3)

    # Lane-dense toy config: hidden = 256 (split 128 / 128).
    N, C = 512, 256
    x = jax.random.normal(k_x, (N, C), jnp.float32)

    fn = AdditiveCouplingFn(C, k_fn)
    module = InvertibleModuleWrapper(fn, keep_input=False)

    y = jax.block_until_ready(module(x))
    y_ref = _reference_forward(x, fn.wf, fn.bf, fn.wg, fn.bg)
    np.testing.assert_allclose(np.asarray(y), np.asarray(y_ref),
                               rtol=1e-3, atol=1e-3)

    # Ragged N (not a tile multiple): exercises the masked last block — no
    # pad / slice HBM round trips on the wrapper side.
    x_rag = jax.random.normal(k_x2, (300, C), jnp.float32)
    y_rag = jax.block_until_ready(module(x_rag))
    y_rag_ref = _reference_forward(x_rag, fn.wf, fn.bf, fn.wg, fn.bg)
    np.testing.assert_allclose(np.asarray(y_rag), np.asarray(y_rag_ref),
                               rtol=1e-3, atol=1e-3)

    # Sanity: module is actually invertible (x == inverse(forward(x)))
    x_rec = jax.block_until_ready(module.inverse(y))
    np.testing.assert_allclose(np.asarray(x_rec), np.asarray(x),
                               rtol=1e-2, atol=1e-2)

    print("KERNEL_OK")
</pallas_src>

<mosaic_0001>
module attributes {stable_mosaic.version = 11 : i64} {
  func.func @_coupling_fwd_kernel(%arg0: i32, %arg1: memref<64x256xf32, #tpu.memory_space<vmem>>, %arg2: memref<128x128xbf16, #tpu.memory_space<vmem>>, %arg3: memref<1x128xf32, #tpu.memory_space<vmem>>, %arg4: memref<128x128xbf16, #tpu.memory_space<vmem>>, %arg5: memref<1x128xf32, #tpu.memory_space<vmem>>, %arg6: memref<64x256xf32, #tpu.memory_space<vmem>>) attributes {dimension_semantics = [#tpu.dimension_semantics<parallel>], iteration_bounds = array<i64: 8>, scalar_prefetch = 0 : i64, scratch_operands = 0 : i64, tpu.core_type = #tpu.core_type<tc>, window_params = [{transform_indices = @transform_0, window_bounds = array<i64: 64, 256>}, {pipeline_mode = #tpu.pipeline_mode<synchronous>, transform_indices = @transform_1, window_bounds = array<i64: 128, 128>}, {pipeline_mode = #tpu.pipeline_mode<synchronous>, transform_indices = @transform_2, window_bounds = array<i64: 1, 128>}, {pipeline_mode = #tpu.pipeline_mode<synchronous>, transform_indices = @transform_3, window_bounds = array<i64: 128, 128>}, {pipeline_mode = #tpu.pipeline_mode<synchronous>, transform_indices = @transform_4, window_bounds = array<i64: 1, 128>}, {transform_indices = @transform_5, window_bounds = array<i64: 64, 256>}]} {
    %c0 = arith.constant 0 : index
    %c0_0 = arith.constant 0 : index
    %0 = vector.load %arg1[%c0, %c0_0] : memref<64x256xf32, #tpu.memory_space<vmem>>, vector<64x128xf32>
    %c0_1 = arith.constant 0 : index
    %c128 = arith.constant 128 : index
    %1 = vector.load %arg1[%c0_1, %c128] : memref<64x256xf32, #tpu.memory_space<vmem>>, vector<64x128xf32>
    %2 = arith.truncf %1 : vector<64x128xf32> to vector<64x128xbf16>
    %c0_2 = arith.constant 0 : index
    %c0_3 = arith.constant 0 : index
    %3 = vector.load %arg2[%c0_2, %c0_3] : memref<128x128xbf16, #tpu.memory_space<vmem>>, vector<128x128xbf16>
    %cst = arith.constant dense<0.000000e+00> : vector<64x128xf32>
    %4 = tpu.matmul %2, %3, %cst {dimension_numbers = #tpu.dot_dimension_numbers<[1], [0], [0], [1], [0, 0, 1, 1], [], []>} : vector<64x128xbf16>, vector<128x128xbf16>, vector<64x128xf32> -> vector<64x128xf32>
    %c0_4 = arith.constant 0 : index
    %c0_5 = arith.constant 0 : index
    %5 = vector.load %arg3[%c0_4, %c0_5] : memref<1x128xf32, #tpu.memory_space<vmem>>, vector<1x128xf32>
    %6 = vector.broadcast %5 : vector<1x128xf32> to vector<64x128xf32>
    %7 = arith.addf %4, %6 : vector<64x128xf32>
    %cst_6 = arith.constant 0.000000e+00 : f32
    %8 = vector.broadcast %cst_6 : f32 to vector<64x128xf32>
    %9 = arith.maximumf %7, %8 : vector<64x128xf32>
    %10 = arith.addf %0, %9 : vector<64x128xf32>
    %11 = arith.truncf %10 : vector<64x128xf32> to vector<64x128xbf16>
    %c0_7 = arith.constant 0 : index
    %c0_8 = arith.constant 0 : index
    %12 = vector.load %arg4[%c0_7, %c0_8] : memref<128x128xbf16, #tpu.memory_space<vmem>>, vector<128x128xbf16>
    %cst_9 = arith.constant dense<0.000000e+00> : vector<64x128xf32>
    %13 = tpu.matmul %11, %12, %cst_9 {dimension_numbers = #tpu.dot_dimension_numbers<[1], [0], [0], [1], [0, 0, 1, 1], [], []>} : vector<64x128xbf16>, vector<128x128xbf16>, vector<64x128xf32> -> vector<64x128xf32>
    %c0_10 = arith.constant 0 : index
    %c0_11 = arith.constant 0 : index
    %14 = vector.load %arg5[%c0_10, %c0_11] : memref<1x128xf32, #tpu.memory_space<vmem>>, vector<1x128xf32>
    %15 = vector.broadcast %14 : vector<1x128xf32> to vector<64x128xf32>
    %16 = arith.addf %13, %15 : vector<64x128xf32>
    %cst_12 = arith.constant 0.000000e+00 : f32
    %17 = vector.broadcast %cst_12 : f32 to vector<64x128xf32>
    %18 = arith.maximumf %16, %17 : vector<64x128xf32>
    %19 = arith.addf %1, %18 : vector<64x128xf32>
    %c0_13 = arith.constant 0 : index
    %c0_14 = arith.constant 0 : index
    %20 = vector.load %arg6[%c0_13, %c0_14] : memref<64x256xf32, #tpu.memory_space<vmem>>, vector<64x128xf32>
    tpu.vector_store %arg6[%c0_13, %c0_14], %10 {strides = array<i32>} : memref<64x256xf32, #tpu.memory_space<vmem>>, vector<64x128xf32>,
    %c0_15 = arith.constant 0 : index
    %c128_16 = arith.constant 128 : index
    %21 = vector.load %arg6[%c0_15, %c128_16] : memref<64x256xf32, #tpu.memory_space<vmem>>, vector<64x128xf32>
    tpu.vector_store %arg6[%c0_15, %c128_16], %19 {strides = array<i32>} : memref<64x256xf32, #tpu.memory_space<vmem>>, vector<64x128xf32>,
    return
  }
  func.func @transform_0(%arg0: i32) -> (i32, i32) {
    %c0_i32 = arith.constant 0 : i32
    %c0_i32_0 = arith.constant 0 : i32
    return %arg0, %c0_i32 : i32, i32
  }
  func.func @transform_1(%arg0: i32) -> (i32, i32) {
    %c0_i32 = arith.constant 0 : i32
    %c0_i32_0 = arith.constant 0 : i32
    %c0_i32_1 = arith.constant 0 : i32
    return %c0_i32, %c0_i32_0 : i32, i32
  }
  func.func @transform_2(%arg0: i32) -> (i32, i32) {
    %c0_i32 = arith.constant 0 : i32
    %c0_i32_0 = arith.constant 0 : i32
    %c0_i32_1 = arith.constant 0 : i32
    return %c0_i32, %c0_i32_0 : i32, i32
  }
  func.func @transform_3(%arg0: i32) -> (i32, i32) {
    %c0_i32 = arith.constant 0 : i32
    %c0_i32_0 = arith.constant 0 : i32
    %c0_i32_1 = arith.constant 0 : i32
    return %c0_i32, %c0_i32_0 : i32, i32
  }
  func.func @transform_4(%arg0: i32) -> (i32, i32) {
    %c0_i32 = arith.constant 0 : i32
    %c0_i32_0 = arith.constant 0 : i32
    %c0_i32_1 = arith.constant 0 : i32
    return %c0_i32, %c0_i32_0 : i32, i32
  }
  func.func @transform_5(%arg0: i32) -> (i32, i32) {
    %c0_i32 = arith.constant 0 : i32
    %c0_i32_0 = arith.constant 0 : i32
    return %arg0, %c0_i32 : i32, i32
  }
}

</mosaic_0001>

<bundles_post_ra>
// kernel: tpu_custom_call.1
= control target key start
LH: loop header
LB: loop body
LE: loop exit
PB: predicated region body
PF: predicated region fallthrough
CT: control target
= control target key end

     0   :  { %10 = vsyncpa [#allocation3], 0  ;;  %s1269_s0 = inlined_call_operand.hbm [shape: f32[512,256], index: 0, kind: input, shape index: {}]   ;;  %s1270_s1 = inlined_call_operand.hbm [shape: bf16[128,128], index: 1, kind: input, shape index: {}]   ;;  %s1271_s2 = inlined_call_operand.vmem [shape: f32[1,128], index: 2, kind: input, shape index: {}]   ;;  %s1272_s3 = inlined_call_operand.hbm [shape: bf16[128,128], index: 3, kind: input, shape index: {}]   ;;  %s1273_s4 = inlined_call_operand.vmem [shape: f32[1,128], index: 4, kind: input, shape index: {}]   ;;  %s1274_s5 = inlined_call_operand.hbm [shape: f32[512,256], index: 5, kind: output, shape index: {}]  }
   0x1   :  { %12 = vsyncpa [#allocation3 + $0x1], 0 }
   0x2   :  { %13 = vsyncpa [#allocation6], 0 }
   0x3   :  { %14 = vsyncpa [#allocation4], 0 }
   0x4   :  { %16 = vsyncpa [#allocation4 + $0x1], 0  ;;  %s1051_s18 = smov 0   ;;  %s1053_s19 = smov 0  }
   0x5   :  { %s1055_s20 = smov 0   ;;  %s1057_s21 = smov 0  }
   0x6 LB: > { %s1072_s22 = sadd.s32 4294967295, %s1011_s21   ;;  %s656_s23 = sadd.s32 4294967294, %s1011_s21   ;;  %s1011_s21 = sphi %s1057_s21, %s1283_s21   ;;  %s1007_s20 = sphi %s1055_s20, %s1282_s20   ;;  %s1003_s19 = sphi %s1053_s19, %s1281_s19   ;;  %s999_s18 = sphi %s1051_s18, %s1280_s18  }
   0x7   : > { %p42_p0 = scmp.ne.s32.totalorder %s1003_s19, %s999_s18  ;;  %p43_p1 = scmp.eq.s32.totalorder %s1072_s22, 0 }
   0x8   : > { %p150_p2 = scmp.eq.s32.totalorder %s1072_s22, 7  ;;  %p156_p3 = scmp.eq.s32.totalorder %s656_s23, 7 }
   0x9   : > { %p1081_p4 = por %p43_p1, %p42_p0  ;;  %p657_p5 = scmp.ge.s32.totalorder %s1011_s21, 1 }
   0xa   : > { %p1086_p6 = por %p156_p3, %p42_p0  ;;  %p163_p7 = scmp.lt.s32.totalorder %s1011_s21, 9 }
   0xb   : > { %s174_s28 = sshll.u32 %s1270_s1, 4  ;;  %s1013_s30 = smov [#allocation5]   ;;  %s175_s28 = int_to_ptr.hbm [resolvable:$true] %s174_s28 }
   0xc   : > { %p1094_p8 = pnand %p657_p5, %p163_p7  ;;  %s176_s6 = sshll.u32 %s1013_s30, 4  ;;  %s177_s6 = int_to_ptr.vmem [resolvable:$true] %s176_s6 }
   0xd   : > { %s191_s9 = sshll.u32 %s1272_s3, 4  ;;  %s1014_s10 = smov 64   ;;  %s192_s9 = int_to_ptr.hbm [resolvable:$true] %s191_s9 }
   0xe   : > { %p788_p9 = pneg %p1094_p8  ;;  %s1015_s11 = smov 4  }
   0xf   : > { %s1016_s12 = smov [#allocation7]   ;;  %s1106_s14 = sadd.s32 1, %s1011_s21  }
  0x10   : > { %p789_p10 = pnand %p788_p9, %p43_p1  ;;  %s193_s13 = sshll.u32 %s1016_s12, 4  ;;  %s194_s13 = int_to_ptr.vmem [resolvable:$true] %s193_s13 }
  0x11   : > { %s29_s15 = sadd.s32 1, %s1007_s20  ;;  %s26_s16 = ssub.s32 %s1011_s21, %s1106_s14 }
  0x12   : > { %791 = dma.hbm_to_vmem [thread:$0]  (!%p789_p10), %s175_s28, 1024, %s177_s6, [#allocation6], %s1014_s10, %s1014_s10, %s1015_s11  }
  0x13   : > { %794 = dma.hbm_to_vmem [thread:$0]  (!%p789_p10), %s192_s9, 1024, %s194_s13, [#allocation6], %s1014_s10, %s1014_s10, %s1015_s11  }
  0x14   : > { %p36_p11 = scmp.ne.s32.totalorder %s1007_s20, %s1003_s19  ;;  %p27_p12 = scmp.eq.s32.totalorder %s26_s16, 0 }
  0x15   : > { %p37_p13 = scmp.eq.s32.totalorder %s1011_s21, 0  ;;  %p805_p3 = scmp.lt.s32.totalorder %s1011_s21, 8 }
  0x16   : > { %p1116_p0 = por %p150_p2, %p36_p11  ;;  %s210_s26 = sand.u32 1, %s1007_s20  }
  0x17   : > { %s1122_s23 = scalar_select %p27_p12, %s1007_s20, %s29_s15  }
  0x18   : > { %p38_p5 = por %p37_p13, %p36_p11  ;;  %s661_s27 = sshll.u32 %s210_s26, 7 }
  0x19   : > { %s741_s28 = sshll.u32 %s1011_s21, 7  ;;  %s214_s8 = scalar_lea.vmem [#allocation2], %s661_s27 }
  0x1a   : > { %s220_s7 = scalar_lea.hbm %s1269_s0, %s741_s28  ;;  %s223_s9 = sshll.u32 %s214_s8, 4  ;;  %s224_s9 = int_to_ptr.vmem [resolvable:$true] %s223_s9 }
  0x1b   : > { %s221_s10 = sshll.u32 %s220_s7, 4  ;;  %p1129_p2 = pnand %p805_p3, %p38_p5  ;;  %s222_s10 = int_to_ptr.hbm [resolvable:$true] %s221_s10 }
  0x1c   : > { %s211_s12 = scalar_lea.sflag [#allocation3], %s210_s26  ;;  %s911_s13 = sshra.s32 %s222_s10, 4  ;;  %s912_s13 = int_to_ptr.hbm [resolvable:$true] %s911_s13 }
  0x1d   : > { %s913_s15 = scalar_lea.hbm %s912_s13, 128  ;;  %p915_p9 = pneg %p1129_p2 }
  0x1e   : > { %p914_p7 = scmp.ne.s32.totalorder %s912_s13, %s913_s15  ;;  %s918_s28 = scalar_lea.hbm %s1269_s0, 1024 }
  0x1f   : > { %p919_p12 = scmp.lt.s32.totalorder %s912_s13, %s1269_s0  ;;  %p920_p13 = scmp.lt.s32.totalorder %s918_s28, %s913_s15 }
  0x20   : > { %p916_p10 = pnand %p915_p9, %p914_p7 }
  0x21   : > { %p921_p3 = por %p920_p13, %p919_p12 }
  0x22   : > { %p917_p11 = pneg %p916_p10 }
  0x24   : > { %p922_p5 = pnand %p921_p3, %p917_p11 }
  0x26   : > { %925 = shalt.err (!%p922_p5)
}
  0x27   : > { %s1017_s26 = smov 256   ;;  %s1018_s7 = smov 16  }
  0x28   : > { %798 = dma.hbm_to_vmem [thread:$0]  (!%p1129_p2), %s222_s10, 2048, %s224_s9, %s211_s12, %s1017_s26, %s1017_s26, %s1018_s7  }
  0x29   : > { %235 = sbr.rel (%p1094_p8) target bundleno = 395 (0x18b), region = 40  ;;  %s1146_s8 = sand.u32 (!%p1094_p8), 1, %s1003_s19  }
  0x2a   : > { %s666_s13 = sshll.u32 (!%p1094_p8), %s1146_s8, 7  ;;  %s238_s15 = scalar_lea.sflag (!%p1094_p8), [#allocation3], %s1146_s8 }
  0x2b   : > { %s1152_s16 = scalar_lea.vmem (!%p1094_p8), [#allocation2], %s666_s13 }
  0x2e   : > { %986 = dma.done.wait (%p1081_p4), %s238_s15, 2048  }
  0x2f   : > { %988 = vsyncadd (%p1081_p4), %s238_s15, 4294965248 }
  0x30   : > { %990 = dma.done.wait (%p43_p1), [#allocation6], 2048  }
  0x31   : > { %992 = vsyncadd (%p43_p1), [#allocation6], 4294965248  ;;  %v749_v0 = vld [vmem:[#allocation5 + $0x38] sm:$0xff]  ;;  %v748_v1 = vld [vmem:[#allocation5 + $0x30] sm:$0xff]  ;;  %s1200_s9 = scalar_lea.vmem [#allocation8], %s666_s13  ;;  %s759_s12 = sshll.u32 %s1072_s22, 7 }
  0x32   : > { %369 = vmatpush.bf16.msra.mxu0 %v749_v0  ;;  %760 = vmatpush.bf16.msra.mxu2 %v749_v0  ;;  %v747_v2 = vld [vmem:[#allocation5 + $0x28] sm:$0xff]  ;;  %v746_v3 = vld [vmem:[#allocation5 + $0x20] sm:$0xff]  ;;  %v745_v4 = vld [vmem:[#allocation5 + $0x18] sm:$0xff]  ;;  %s560_s30 = scalar_lea.hbm %s1274_s5, %s759_s12  ;;  %s561_s6 = sshll.u32 %s1200_s9, 4  ;;  %s562_s6 = int_to_ptr.vmem [resolvable:$true] %s561_s6 }
  0x33   : > { %v757_v5 = vld [vmem:[#allocation7 + $0x38] sm:$0xff]  ;;  %v744_v6 = vld [vmem:[#allocation5 + $0x10] sm:$0xff]  ;;  %v743_v8 = vld [vmem:[#allocation5 + $0x8] sm:$0xff]  ;;  %s563_s26 = sshll.u32 %s560_s30, 4  ;;  %s548_s7 = scalar_lea.sflag [#allocation4], %s1146_s8  ;;  %s564_s26 = int_to_ptr.hbm [resolvable:$true] %s563_s26 }
  0x34   : > { %486 = vmatpush.bf16.msra.mxu1 %v757_v5  ;;  %v756_v7 = vld [vmem:[#allocation7 + $0x30] sm:$0xff]  ;;  %768 = vmatpush.bf16.msra.mxu3 %v757_v5  ;;  %v755_v9 = vld [vmem:[#allocation7 + $0x28] sm:$0xff]  ;;  %v742_v10 = vld [vmem:[#allocation5] sm:$0xff]  ;;  %s955_s22 = sshra.s32 %s564_s26, 4  ;;  %s961_s24 = scalar_lea.hbm %s1274_s5, 1024  ;;  %s956_s22 = int_to_ptr.hbm [resolvable:$true] %s955_s22 }
  0x35   : > { %v1163_v11 = vld [vmem:[%s1152_s16 + $0x8] sm:$0xff]  ;;  %v1166_v12 = vld [vmem:[%s1152_s16 + $0x18] sm:$0xff]  ;;  %v754_v15 = vld [vmem:[#allocation7 + $0x20] sm:$0xff]  ;;  %s957_s13 = scalar_lea.hbm %s956_s22, 128  ;;  %p962_p2 = scmp.lt.s32.totalorder %s956_s22, %s1274_s5 }
  0x36   : > { %370 = vmatpush.bf16.msra.mxu0 %v748_v1  ;;  %761 = vmatpush.bf16.msra.mxu2 %v748_v1  ;;  %v1169_v13 = vld [vmem:[%s1152_s16 + $0x48] sm:$0xff]  ;;  %v1172_v14 = vld [vmem:[%s1152_s16 + $0x58] sm:$0xff]  ;;  %v297_v16 = vpack.c.bf16 %v1166_v12, %v1163_v11  ;;  %v752_v25 = vld [vmem:[#allocation7 + $0x10] sm:$0xff]  ;;  %p958_p1 = scmp.ne.s32.totalorder %s956_s22, %s957_s13  ;;  %p963_p7 = scmp.lt.s32.totalorder %s961_s24, %s957_s13 }
  0x37   : > { %v299_v17 = vpack.c.bf16 %v1172_v14, %v1169_v13  ;;  %v1179_v18 = vld [vmem:[%s1152_s16 + $0x28] sm:$0xff]  ;;  %v1182_v19 = vld [vmem:[%s1152_s16 + $0x38] sm:$0xff]  ;;  %v750_v27 = vld [vmem:[#allocation7] sm:$0xff] }
  0x38   : > { %487 = vmatpush.bf16.msra.mxu1 %v756_v7  ;;  %769 = vmatpush.bf16.msra.mxu3 %v756_v7  ;;  %v1185_v20 = vld [vmem:[%s1152_s16 + $0x68] sm:$0xff]  ;;  %v1188_v21 = vld [vmem:[%s1152_s16 + $0x78] sm:$0xff]  ;;  %v298_v22 = vpack.c.bf16 %v1182_v19, %v1179_v18  ;;  %v849_v28 = vld [vmem:[%s1271_s2] ss:$0 sm:$0xff]  ;;  %p959_p4 = pnand %p958_p1, %p1116_p0  ;;  %p964_p9 = por %p963_p7, %p962_p2 }
  0x39   : > { %v300_v23 = vpack.c.bf16 %v1188_v21, %v1185_v20  ;;  %v753_v24 = vld [vmem:[#allocation7 + $0x18] sm:$0xff]  ;;  %v751_v26 = vld [vmem:[#allocation7 + $0x8] sm:$0xff]  ;;  %v281_v31 = vld [vmem:[%s1152_s16] sm:$0xff] }
  0x3a   : > { %371 = vmatpush.bf16.msra.mxu0 %v747_v2  ;;  %762 = vmatpush.bf16.msra.mxu2 %v747_v2  ;;  %v285_v36 = vld [vmem:[%s1152_s16 + $0x40] sm:$0xff]  ;;  %v282_v40 = vld [vmem:[%s1152_s16 + $0x10] sm:$0xff]  ;;  %p960_p8 = pneg %p959_p4 }
  0x3b   : > { %v286_v47 = vld [vmem:[%s1152_s16 + $0x50] sm:$0xff]  ;;  %v283_v51 = vld [vmem:[%s1152_s16 + $0x20] sm:$0xff] }
  0x3c   : > { %488 = vmatpush.bf16.msra.mxu1 %v755_v9  ;;  %770 = vmatpush.bf16.msra.mxu3 %v755_v9  ;;  %v287_v58 = vld [vmem:[%s1152_s16 + $0x60] sm:$0xff]  ;;  %v284_v62 = vld [vmem:[%s1152_s16 + $0x30] sm:$0xff]  ;;  %p965_p10 = pnand %p964_p9, %p960_p8 }
  0x3d   : > { %v288_v5 = vld [vmem:[%s1152_s16 + $0x70] sm:$0xff]  ;;  %v850_v9 = vld [vmem:[%s1273_s4] ss:$0 sm:$0xff] }
  0x3e   : > { %372 = vmatpush.bf16.msra.mxu0 %v746_v3  ;;  %763 = vmatpush.bf16.msra.mxu2 %v746_v3 }
  0x40   : > { %489 = vmatpush.bf16.msra.mxu1 %v754_v15  ;;  %771 = vmatpush.bf16.msra.mxu3 %v754_v15 }
  0x42   : > { %373 = vmatpush.bf16.msra.mxu0 %v745_v4  ;;  %764 = vmatpush.bf16.msra.mxu2 %v745_v4 }
  0x44   : > { %490 = vmatpush.bf16.msra.mxu1 %v753_v24  ;;  %772 = vmatpush.bf16.msra.mxu3 %v753_v24 }
  0x46   : > { %374 = vmatpush.bf16.msra.mxu0 %v744_v6  ;;  %765 = vmatpush.bf16.msra.mxu2 %v744_v6 }
  0x48   : > { %491 = vmatpush.bf16.msra.mxu1 %v752_v25  ;;  %773 = vmatpush.bf16.msra.mxu3 %v752_v25 }
  0x4a   : > { %375 = vmatpush.bf16.msra.mxu0 %v743_v8  ;;  %766 = vmatpush.bf16.msra.mxu2 %v743_v8 }
  0x4c   : > { %492 = vmatpush.bf16.msra.mxu1 %v751_v26  ;;  %774 = vmatpush.bf16.msra.mxu3 %v751_v26 }
  0x4e   : > { %376 = vmatpush.bf16.msra.mxu0 %v742_v10  ;;  %767 = vmatpush.bf16.msra.mxu2 %v742_v10 }
  0x50   : > { %493 = vmatpush.bf16.msra.mxu1 %v750_v27  ;;  %775 = vmatpush.bf16.msra.mxu3 %v750_v27 }
  0x51   : > { %377 = vmatmul.bf16.vlgmr.msra.gmra.mxu0 %v297_v16  ;;  %387 = vmatmul.bf16.vlgmr.msra.gmra.mxu2 %v299_v17 }
  0x61   : > { %382 = vmatmul.bf16.gmra.mxu0 %v298_v22  ;;  %392 = vmatmul.bf16.gmra.mxu2 %v300_v23 }
  0xce   : > { %v378_v29 = vpop.f32.mrf.mxu0 }
  0xcf   : > { %v379_v30 = vadd.f32 %v849_v28, %v378_v29 }
  0xd1   : > { %v398_v32 = vmax.f32 %v379_v30, 0.0 }
  0xd3   : > { %v406_v33 = vadd.f32 %v398_v32, %v281_v31 }
  0xd4   : > { %v388_v34 = vpop.f32.mrf.mxu2 }
  0xd5   : > { %531 = vst [vmem:[%s1200_s9] sm:$0xff] %v406_v33  ;;  %v389_v35 = vadd.f32 %v849_v28, %v388_v34 }
  0xd6   : > { %v380_v37 = vpop.f32.mrf.mxu0 }
  0xd7   : > { %v402_v38 = vmax.f32 %v389_v35, 0.0  ;;  %v381_v39 = vadd.f32 %v849_v28, %v380_v37 }
  0xd9   : > { %v410_v41 = vadd.f32 %v402_v38, %v285_v36  ;;  %v399_v42 = vmax.f32 %v381_v39, 0.0 }
  0xdb   : > { %535 = vst [vmem:[%s1200_s9 + $0x40] sm:$0xff] %v410_v41  ;;  %v407_v43 = vadd.f32 %v399_v42, %v282_v40 }
  0xdc   : > { %v390_v44 = vpop.f32.mrf.mxu2 }
  0xdd   : > { %532 = vst [vmem:[%s1200_s9 + $0x10] sm:$0xff] %v407_v43  ;;  %v391_v45 = vadd.f32 %v849_v28, %v390_v44  ;;  %v414_v46 = vpack.c.bf16 %v407_v43, %v406_v33 }
  0xde   : > { %v383_v48 = vpop.f32.mrf.mxu0 }
  0xdf   : > { %v403_v49 = vmax.f32 %v391_v45, 0.0  ;;  %v384_v50 = vadd.f32 %v849_v28, %v383_v48  ;;  %494 = vmatmul.bf16.vlgmr.msra.gmra.mxu1 %v414_v46 }
  0xe1   : > { %v411_v52 = vadd.f32 %v403_v49, %v286_v47  ;;  %v400_v53 = vmax.f32 %v384_v50, 0.0 }
  0xe3   : > { %536 = vst [vmem:[%s1200_s9 + $0x50] sm:$0xff] %v411_v52  ;;  %v408_v54 = vadd.f32 %v400_v53, %v283_v51  ;;  %v416_v55 = vpack.c.bf16 %v411_v52, %v410_v41 }
  0xe4   : > { %v393_v56 = vpop.f32.mrf.mxu2 }
  0xe5   : > { %533 = vst [vmem:[%s1200_s9 + $0x20] sm:$0xff] %v408_v54  ;;  %v394_v57 = vadd.f32 %v849_v28, %v393_v56  ;;  %504 = vmatmul.bf16.vlgmr.msra.gmra.mxu3 %v416_v55 }
  0xe6   : > { %v385_v59 = vpop.f32.mrf.mxu0 }
  0xe7   : > { %v404_v60 = vmax.f32 %v394_v57, 0.0  ;;  %v386_v61 = vadd.f32 %v849_v28, %v385_v59 }
  0xe9   : > { %v412_v63 = vadd.f32 %v404_v60, %v287_v58  ;;  %v401_v0 = vmax.f32 %v386_v61, 0.0 }
  0xeb   : > { %537 = vst [vmem:[%s1200_s9 + $0x60] sm:$0xff] %v412_v63  ;;  %v409_v1 = vadd.f32 %v401_v0, %v284_v62 }
  0xec   : > { %v395_v2 = vpop.f32.mrf.mxu2 }
  0xed   : > { %534 = vst [vmem:[%s1200_s9 + $0x30] sm:$0xff] %v409_v1  ;;  %v396_v3 = vadd.f32 %v849_v28, %v395_v2  ;;  %v415_v4 = vpack.c.bf16 %v409_v1, %v408_v54 }
  0xef   : > { %v405_v6 = vmax.f32 %v396_v3, 0.0  ;;  %499 = vmatmul.bf16.gmra.mxu1 %v415_v4 }
  0xf1   : > { %v413_v7 = vadd.f32 %v405_v6, %v288_v5 }
  0xf3   : > { %538 = vst [vmem:[%s1200_s9 + $0x70] sm:$0xff] %v413_v7  ;;  %v417_v8 = vpack.c.bf16 %v413_v7, %v412_v63 }
  0xf5   : > { %509 = vmatmul.bf16.gmra.mxu3 %v417_v8 }
 0x15c   : > { %v495_v10 = vpop.f32.mrf.mxu1 }
 0x15d   : > { %v496_v15 = vadd.f32 %v850_v9, %v495_v10 }
 0x15f   : > { %v515_v16 = vmax.f32 %v496_v15, 0.0 }
 0x161   : > { %v523_v17 = vadd.f32 %v515_v16, %v1163_v11 }
 0x163   : > { %539 = vst [vmem:[%s1200_s9 + $0x8] sm:$0xff] %v523_v17 }
 0x164   : > { %v497_v22 = vpop.f32.mrf.mxu1 }
 0x165   : > { %v498_v23 = vadd.f32 %v850_v9, %v497_v22 }
 0x167   : > { %v516_v24 = vmax.f32 %v498_v23, 0.0 }
 0x168   : > { %v505_v25 = vpop.f32.mrf.mxu3 }
 0x169   : > { %v524_v26 = vadd.f32 %v516_v24, %v1166_v12  ;;  %v506_v27 = vadd.f32 %v850_v9, %v505_v25 }
 0x16b   : > { %540 = vst [vmem:[%s1200_s9 + $0x18] sm:$0xff] %v524_v26  ;;  %v519_v28 = vmax.f32 %v506_v27, 0.0 }
 0x16c   : > { %v500_v29 = vpop.f32.mrf.mxu1 }
 0x16d   : > { %v527_v30 = vadd.f32 %v519_v28, %v1169_v13  ;;  %v501_v31 = vadd.f32 %v850_v9, %v500_v29 }
 0x16f   : > { %543 = vst [vmem:[%s1200_s9 + $0x48] sm:$0xff] %v527_v30  ;;  %v517_v32 = vmax.f32 %v501_v31, 0.0 }
 0x170   : > { %v507_v11 = vpop.f32.mrf.mxu3 }
 0x171   : > { %v525_v33 = vadd.f32 %v517_v32, %v1179_v18  ;;  %v508_v34 = vadd.f32 %v850_v9, %v507_v11 }
 0x173   : > { %541 = vst [vmem:[%s1200_s9 + $0x28] sm:$0xff] %v525_v33  ;;  %v520_v35 = vmax.f32 %v508_v34, 0.0 }
 0x174   : > { %v502_v12 = vpop.f32.mrf.mxu1 }
 0x175   : > { %v528_v36 = vadd.f32 %v520_v35, %v1172_v14  ;;  %v503_v37 = vadd.f32 %v850_v9, %v502_v12 }
 0x177   : > { %544 = vst [vmem:[%s1200_s9 + $0x58] sm:$0xff] %v528_v36  ;;  %v518_v38 = vmax.f32 %v503_v37, 0.0 }
 0x178   : > { %v510_v13 = vpop.f32.mrf.mxu3 }
 0x179   : > { %v526_v39 = vadd.f32 %v518_v38, %v1182_v19  ;;  %v511_v40 = vadd.f32 %v850_v9, %v510_v13 }
 0x17b   : > { %542 = vst [vmem:[%s1200_s9 + $0x38] sm:$0xff] %v526_v39  ;;  %v521_v41 = vmax.f32 %v511_v40, 0.0 }
 0x17d   : > { %v529_v18 = vadd.f32 %v521_v41, %v1185_v20 }
 0x17f   : > { %545 = vst [vmem:[%s1200_s9 + $0x68] sm:$0xff] %v529_v18 }
 0x180   : > { %v512_v14 = vpop.f32.mrf.mxu3 }
 0x181   : > { %v513_v42 = vadd.f32 %v850_v9, %v512_v14 }
 0x183   : > { %v522_v43 = vmax.f32 %v513_v42, 0.0 }
 0x185   : > { %v530_v19 = vadd.f32 %v522_v43, %v1188_v21 }
 0x187   : > { %546 = vst [vmem:[%s1200_s9 + $0x78] sm:$0xff] %v530_v19 }
 0x188   : > { %968 = shalt.err (!%p965_p10)
}
 0x189   : > { %s1019_s8 = smov 256   ;;  %s1020_s9 = smov 16  }
 0x18a   : > { %786 = dma.vmem_to_hbm [thread:$0]  (%p1116_p0), %s562_s6, 2048, %s564_s26, %s548_s7, %s1019_s8, %s1019_s8, %s1020_s9  }
 0x18b PF: > { %p808_p11 = scmp.ge.s32.totalorder %s1011_s21, 2  ;;  %s578_s11 = sand.u32 1, %s999_s18  }
 0x18c   : > { %s579_s12 = scalar_lea.sflag [#allocation4], %s578_s11 }
 0x18d   : > { %p800_p12 = pnand %p808_p11, %p1086_p6 }
 0x18f   : > { %p801_p13 = pneg %p800_p12 }
 0x191   : > { %994 = dma.done.wait (%p801_p13), %s579_s12, 2048  }
 0x192   : > { %996 = vsyncadd (%p801_p13), %s579_s12, 4294965248  ;;  %p19_p3 = scmp.ge.s32.totalorder %s1106_s14, 10   ;;  %s1280_s18 = smov %s1003_s19 }
 0x193   : > { %s1281_s19 = smov %s1007_s20  ;;  %s1282_s20 = smov %s1122_s23 }
 0x194   : > { %s1283_s21 = smov %s1106_s14  ;;  %21 = sbr.rel (!%p19_p3) target bundleno = 6 (0x6), region = 93 }
 0x199   :  { %585 = vsyncpa [#allocation3], 1 }
 0x19a   :  { %587 = vsyncpa [#allocation3 + $0x1], 1 }
 0x19b   :  { %588 = vsyncpa [#allocation6], 1 }
 0x19c   :  { %589 = vsyncpa [#allocation4], 1 }
 0x19d   :  { %591 = vsyncpa [#allocation4 + $0x1], 1 }

</bundles_post_ra>
